<compile_context>
chip_gen: v7x
topology: tpu7x:2x2x1
jax: 0.10.0
libtpu: 0.0.40
codegen_flags: <defaults>
</compile_context>

<pallas_src>
import jax
import jax.numpy as jnp
import numpy as np
from jax.experimental import pallas as pl
from jax.experimental.pallas import tpu as pltpu

LANE = 128
SUBLANE = 8


def _round_up(n, m):
    return ((n + m - 1) // m) * m


def _mlp_kernel(x_ref, w1_ref, b1_ref, w2_ref, b2_ref, w3_ref, b3_ref,
                w4_ref, b4_ref, o_ref):
    """One packed batch tile: 4 fused matmuls (+ bias, tanh) on VMEM-resident weights."""
    h = x_ref[...]
    h = jnp.tanh(jnp.dot(h, w1_ref[...], preferred_element_type=jnp.float32) + b1_ref[...])
    h = jnp.tanh(jnp.dot(h, w2_ref[...], preferred_element_type=jnp.float32) + b2_ref[...])
    h = jnp.tanh(jnp.dot(h, w3_ref[...], preferred_element_type=jnp.float32) + b3_ref[...])
    y = jnp.dot(h, w4_ref[...], preferred_element_type=jnp.float32) + b4_ref[...]
    o_ref[...] = y.astype(o_ref.dtype)


def _block_diag(w, pack):
    """(in, out) -> (pack*in, pack*out) block-diagonal replication of w."""
    if pack == 1:
        return w
    din, dout = w.shape
    out = jnp.zeros((pack * din, pack * dout), w.dtype)
    for p in range(pack):
        out = out.at[p * din:(p + 1) * din, p * dout:(p + 1) * dout].set(w)
    return out


def particular_forward(x, params, a1=0.1, tile_rows=4096):
    """x: [B, D_in] float32. params: transposed weights [in, out] + biases [1, out]."""
    # Faithful f32 computation of n * a1 (== 1.0 exactly for a1 = 0.1).
    a1_f = np.float32(a1)
    scale = float(np.float32(np.float32(1.0) / a1_f) * a1_f)

    w1t, b1 = params["w1t"], params["b1"]
    w2t, b2 = params["w2t"], params["b2"]
    w3t, b3 = params["w3t"], params["b3"]
    w4t, b4 = params["w4t"], params["b4"]
    if scale != 1.0:
        # Fold the scalar into weights/biases once here instead of 4 full-tile
        # VPU multiplies per grid step.  (No-op for the default a1 = 0.1.)
        w1t, b1 = w1t * scale, b1 * scale
        w2t, b2 = w2t * scale, b2 * scale
        w3t, b3 = w3t * scale, b3 * scale
        w4t, b4 = w4t * scale, b4 * scale

    B, d_in = x.shape
    h_dim = w1t.shape[1]
    d_out = w4t.shape[1]

    # Pack `pack` real rows per 128-lane row with block-diagonal weights so the
    # narrow hidden dim fills the vreg lanes / MXU.  Extra accumulated terms hit
    # exact-zero weight blocks -> numerically inert.
    pack = max(1, LANE // h_dim)
    in_w, hid_w, out_w = pack * d_in, pack * h_dim, pack * d_out

    w1p = _block_diag(w1t, pack)
    w2p = _block_diag(w2t, pack)
    w3p = _block_diag(w3t, pack)
    w4p = _block_diag(w4t, pack)
    b1p = jnp.tile(b1, (1, pack)) if pack > 1 else b1
    b2p = jnp.tile(b2, (1, pack)) if pack > 1 else b2
    b3p = jnp.tile(b3, (1, pack)) if pack > 1 else b3
    b4p = jnp.tile(b4, (1, pack)) if pack > 1 else b4

    # Batch tiling (in packed rows).  Big tiles amortize per-step pipeline
    # overhead; the x/y blocks are only `in_w`/`out_w` lanes wide so VMEM use is
    # tiny on all generations (careful re-derivation for v7x's 64 MiB included).
    tile_rows = max(SUBLANE, _round_up(tile_rows, SUBLANE))
    bp = -(-B // pack)                              # packed rows with real data
    if bp <= SUBLANE:
        tb = SUBLANE                                # one tiny tile
    elif bp < 2 * tile_rows:
        # At least two tiles so ("parallel",) can use both v7x TensorCores.
        tb = min(tile_rows, _round_up(-(-bp // 2), SUBLANE))
    else:
        tb = tile_rows
    bp_pad = _round_up(bp, tb)
    b_pad = pack * bp_pad

    # Pack x: (B, d_in) -> (bp_pad, pack*d_in).  Contiguous reshape; the HBM
    # array keeps its natural lane width (no 128-lane padding of streamed I/O).
    x_p = jnp.pad(x, ((0, b_pad - B), (0, 0))).reshape(bp_pad, in_w)

    grid = (bp_pad // tb,)
    resident = lambda i: (0, 0)     # weights / biases: same block every step
    row_tile = lambda i: (i, 0)     # x / y: stream along the packed batch axis

    flops = 2 * bp_pad * (in_w * hid_w + 2 * hid_w * hid_w + hid_w * out_w)
    transcendentals = 3 * bp_pad * hid_w
    bytes_accessed = 4 * (bp_pad * (in_w + out_w)
                          + in_w * hid_w + 2 * hid_w * hid_w + hid_w * out_w
                          + 3 * hid_w + out_w)

    y_packed = pl.pallas_call(
        _mlp_kernel,
        out_shape=jax.ShapeDtypeStruct((bp_pad, out_w), jnp.float32),
        grid=grid,
        in_specs=[
            pl.BlockSpec((tb, in_w), row_tile),       # x  (packed rows, natural width)
            pl.BlockSpec((in_w, hid_w), resident),    # W1 (block-diag)
            pl.BlockSpec((1, hid_w), resident),       # b1 (lane-tiled)
            pl.BlockSpec((hid_w, hid_w), resident),   # W2
            pl.BlockSpec((1, hid_w), resident),       # b2
            pl.BlockSpec((hid_w, hid_w), resident),   # W3
            pl.BlockSpec((1, hid_w), resident),       # b3
            pl.BlockSpec((hid_w, out_w), resident),   # W4
            pl.BlockSpec((1, out_w), resident),       # b4
        ],
        out_specs=pl.BlockSpec((tb, out_w), row_tile),
        compiler_params=pltpu.CompilerParams(
            dimension_semantics=("parallel",),
            # 48 MiB: generous on v5e/v6e (128 MiB physical VMEM) while leaving
            # headroom under v7x's 64 MiB.
            vmem_limit_bytes=48 * 1024 * 1024,
        ),
        cost_estimate=pl.CostEstimate(
            flops=flops,
            transcendentals=transcendentals,
            bytes_accessed=bytes_accessed,
        ),
    )(x_p, w1p, b1p, w2p, b2p, w3p, b3p, w4p, b4p)

    # Unpack: (bp_pad, pack*d_out) -> (pack*bp_pad, d_out) -> drop padded rows.
    return y_packed.reshape(b_pad, d_out)[:B]


def init_params(key, d_in, h, d_out):
    """Deterministic init mirroring the torch module's normal_ initializers.
    Weights stored pre-transposed as [in, out]; biases as [1, out]."""
    ks = jax.random.split(key, 8)

    def w(k, fan_in, fan_out, std):
        # torch Linear weight is [out, in]; store the transpose [in, out].
        return (jax.random.normal(k, (fan_out, fan_in), jnp.float32) * std).T

    def b(k, fan_out):
        return jax.random.normal(k, (1, fan_out), jnp.float32)

    return {
        "w1t": w(ks[0], d_in, h, np.sqrt(2.0 / (d_in + h))),
        "b1":  b(ks[1], h),
        "w2t": w(ks[2], h, h, np.sqrt(2.0 / (h + h))),
        "b2":  b(ks[3], h),
        "w3t": w(ks[4], h, h, np.sqrt(2.0 / (h + h))),
        "b3":  b(ks[5], h),
        "w4t": w(ks[6], h, d_out, np.sqrt(2.0 / (h + d_out))),
        "b4":  b(ks[7], d_out),
    }


def reference_forward(x, params, a1=0.1):
    """Pure-JAX reference with identical semantics to the torch module."""
    a1_f = np.float32(a1)
    s = np.float32(1.0) / a1_f * a1_f
    y1 = jnp.tanh(s * (x @ params["w1t"] + params["b1"]))
    y2 = jnp.tanh(s * (y1 @ params["w2t"] + params["b2"]))
    y3 = jnp.tanh(s * (y2 @ params["w3t"] + params["b3"]))
    return s * (y3 @ params["w4t"] + params["b4"])


if __name__ == "__main__":
    key = jax.random.PRNGKey(0)
    k_param, k_x, k_x2 = jax.random.split(key, 3)

    # Small shapes consistent with the module (PINN-style MLP).
    B, D_IN, H, D_OUT = 8, 4, 32, 2
    params = init_params(k_param, D_IN, H, D_OUT)

    x = jax.random.normal(k_x, (B, D_IN), jnp.float32)
    y = jax.block_until_ready(particular_forward(x, params))
    y_ref = reference_forward(x, params)
    np.testing.assert_allclose(np.asarray(y), np.asarray(y_ref),
                               rtol=1e-5, atol=1e-5)

    # A second, still-small batch exercising pack / tile padding and a
    # multi-tile grid (two batch tiles -> both TensorCores on v7x).
    B2 = 1037
    x2 = jax.random.normal(k_x2, (B2, D_IN), jnp.float32)
    y2 = jax.block_until_ready(particular_forward(x2, params))
    y2_ref = reference_forward(x2, params)
    np.testing.assert_allclose(np.asarray(y2), np.asarray(y2_ref),
                               rtol=1e-5, atol=1e-5)

    print("KERNEL_OK")
</pallas_src>

<mosaic_0001>
module attributes {stable_mosaic.version = 11 : i64} {
  func.func @_mlp_kernel(%arg0: i32, %arg1: memref<8x16xf32, #tpu.memory_space<vmem>>, %arg2: memref<16x128xf32, #tpu.memory_space<vmem>>, %arg3: memref<1x128xf32, #tpu.memory_space<vmem>>, %arg4: memref<128x128xf32, #tpu.memory_space<vmem>>, %arg5: memref<1x128xf32, #tpu.memory_space<vmem>>, %arg6: memref<128x128xf32, #tpu.memory_space<vmem>>, %arg7: memref<1x128xf32, #tpu.memory_space<vmem>>, %arg8: memref<128x8xf32, #tpu.memory_space<vmem>>, %arg9: memref<1x8xf32, #tpu.memory_space<vmem>>, %arg10: memref<8x8xf32, #tpu.memory_space<vmem>>) attributes {dimension_semantics = [#tpu.dimension_semantics<parallel>], iteration_bounds = array<i64: 1>, scalar_prefetch = 0 : i64, scratch_operands = 0 : i64, tpu.core_type = #tpu.core_type<tc>, window_params = [{transform_indices = @transform_0, window_bounds = array<i64: 8, 16>}, {pipeline_mode = #tpu.pipeline_mode<synchronous>, transform_indices = @transform_1, window_bounds = array<i64: 16, 128>}, {pipeline_mode = #tpu.pipeline_mode<synchronous>, transform_indices = @transform_2, window_bounds = array<i64: 1, 128>}, {pipeline_mode = #tpu.pipeline_mode<synchronous>, transform_indices = @transform_3, window_bounds = array<i64: 128, 128>}, {pipeline_mode = #tpu.pipeline_mode<synchronous>, transform_indices = @transform_4, window_bounds = array<i64: 1, 128>}, {pipeline_mode = #tpu.pipeline_mode<synchronous>, transform_indices = @transform_5, window_bounds = array<i64: 128, 128>}, {pipeline_mode = #tpu.pipeline_mode<synchronous>, transform_indices = @transform_6, window_bounds = array<i64: 1, 128>}, {pipeline_mode = #tpu.pipeline_mode<synchronous>, transform_indices = @transform_7, window_bounds = array<i64: 128, 8>}, {pipeline_mode = #tpu.pipeline_mode<synchronous>, transform_indices = @transform_8, window_bounds = array<i64: 1, 8>}, {transform_indices = @transform_9, window_bounds = array<i64: 8, 8>}]} {
    %c0 = arith.constant 0 : index
    %c0_0 = arith.constant 0 : index
    %0 = vector.load %arg1[%c0, %c0_0] : memref<8x16xf32, #tpu.memory_space<vmem>>, vector<8x16xf32>
    %c0_1 = arith.constant 0 : index
    %c0_2 = arith.constant 0 : index
    %1 = vector.load %arg2[%c0_1, %c0_2] : memref<16x128xf32, #tpu.memory_space<vmem>>, vector<16x128xf32>
    %cst = arith.constant dense<0.000000e+00> : vector<8x128xf32>
    %2 = tpu.matmul %0, %1, %cst {dimension_numbers = #tpu.dot_dimension_numbers<[1], [0], [0], [1], [0, 0, 1, 1], [], []>} : vector<8x16xf32>, vector<16x128xf32>, vector<8x128xf32> -> vector<8x128xf32>
    %c0_3 = arith.constant 0 : index
    %c0_4 = arith.constant 0 : index
    %3 = vector.load %arg3[%c0_3, %c0_4] : memref<1x128xf32, #tpu.memory_space<vmem>>, vector<1x128xf32>
    %4 = vector.broadcast %3 : vector<1x128xf32> to vector<8x128xf32>
    %5 = arith.addf %2, %4 : vector<8x128xf32>
    %6 = math.tanh %5 : vector<8x128xf32>
    %c0_5 = arith.constant 0 : index
    %c0_6 = arith.constant 0 : index
    %7 = vector.load %arg4[%c0_5, %c0_6] : memref<128x128xf32, #tpu.memory_space<vmem>>, vector<128x128xf32>
    %cst_7 = arith.constant dense<0.000000e+00> : vector<8x128xf32>
    %8 = tpu.matmul %6, %7, %cst_7 {dimension_numbers = #tpu.dot_dimension_numbers<[1], [0], [0], [1], [0, 0, 1, 1], [], []>} : vector<8x128xf32>, vector<128x128xf32>, vector<8x128xf32> -> vector<8x128xf32>
    %c0_8 = arith.constant 0 : index
    %c0_9 = arith.constant 0 : index
    %9 = vector.load %arg5[%c0_8, %c0_9] : memref<1x128xf32, #tpu.memory_space<vmem>>, vector<1x128xf32>
    %10 = vector.broadcast %9 : vector<1x128xf32> to vector<8x128xf32>
    %11 = arith.addf %8, %10 : vector<8x128xf32>
    %12 = math.tanh %11 : vector<8x128xf32>
    %c0_10 = arith.constant 0 : index
    %c0_11 = arith.constant 0 : index
    %13 = vector.load %arg6[%c0_10, %c0_11] : memref<128x128xf32, #tpu.memory_space<vmem>>, vector<128x128xf32>
    %cst_12 = arith.constant dense<0.000000e+00> : vector<8x128xf32>
    %14 = tpu.matmul %12, %13, %cst_12 {dimension_numbers = #tpu.dot_dimension_numbers<[1], [0], [0], [1], [0, 0, 1, 1], [], []>} : vector<8x128xf32>, vector<128x128xf32>, vector<8x128xf32> -> vector<8x128xf32>
    %c0_13 = arith.constant 0 : index
    %c0_14 = arith.constant 0 : index
    %15 = vector.load %arg7[%c0_13, %c0_14] : memref<1x128xf32, #tpu.memory_space<vmem>>, vector<1x128xf32>
    %16 = vector.broadcast %15 : vector<1x128xf32> to vector<8x128xf32>
    %17 = arith.addf %14, %16 : vector<8x128xf32>
    %18 = math.tanh %17 : vector<8x128xf32>
    %c0_15 = arith.constant 0 : index
    %c0_16 = arith.constant 0 : index
    %19 = vector.load %arg8[%c0_15, %c0_16] : memref<128x8xf32, #tpu.memory_space<vmem>>, vector<128x8xf32>
    %cst_17 = arith.constant dense<0.000000e+00> : vector<8x8xf32>
    %20 = tpu.matmul %18, %19, %cst_17 {dimension_numbers = #tpu.dot_dimension_numbers<[1], [0], [0], [1], [0, 0, 1, 1], [], []>} : vector<8x128xf32>, vector<128x8xf32>, vector<8x8xf32> -> vector<8x8xf32>
    %c0_18 = arith.constant 0 : index
    %c0_19 = arith.constant 0 : index
    %21 = vector.load %arg9[%c0_18, %c0_19] : memref<1x8xf32, #tpu.memory_space<vmem>>, vector<1x8xf32>
    %22 = vector.broadcast %21 : vector<1x8xf32> to vector<8x8xf32>
    %23 = arith.addf %20, %22 : vector<8x8xf32>
    %c0_20 = arith.constant 0 : index
    %c0_21 = arith.constant 0 : index
    %24 = vector.load %arg10[%c0_20, %c0_21] : memref<8x8xf32, #tpu.memory_space<vmem>>, vector<8x8xf32>
    tpu.vector_store %arg10[%c0_20, %c0_21], %23 {strides = array<i32>} : memref<8x8xf32, #tpu.memory_space<vmem>>, vector<8x8xf32>,
    return
  }
  func.func @transform_0(%arg0: i32) -> (i32, i32) {
    %c0_i32 = arith.constant 0 : i32
    %c0_i32_0 = arith.constant 0 : i32
    return %arg0, %c0_i32 : i32, i32
  }
  func.func @transform_1(%arg0: i32) -> (i32, i32) {
    %c0_i32 = arith.constant 0 : i32
    %c0_i32_0 = arith.constant 0 : i32
    %c0_i32_1 = arith.constant 0 : i32
    return %c0_i32, %c0_i32_0 : i32, i32
  }
  func.func @transform_2(%arg0: i32) -> (i32, i32) {
    %c0_i32 = arith.constant 0 : i32
    %c0_i32_0 = arith.constant 0 : i32
    %c0_i32_1 = arith.constant 0 : i32
    return %c0_i32, %c0_i32_0 : i32, i32
  }
  func.func @transform_3(%arg0: i32) -> (i32, i32) {
    %c0_i32 = arith.constant 0 : i32
    %c0_i32_0 = arith.constant 0 : i32
    %c0_i32_1 = arith.constant 0 : i32
    return %c0_i32, %c0_i32_0 : i32, i32
  }
  func.func @transform_4(%arg0: i32) -> (i32, i32) {
    %c0_i32 = arith.constant 0 : i32
    %c0_i32_0 = arith.constant 0 : i32
    %c0_i32_1 = arith.constant 0 : i32
    return %c0_i32, %c0_i32_0 : i32, i32
  }
  func.func @transform_5(%arg0: i32) -> (i32, i32) {
    %c0_i32 = arith.constant 0 : i32
    %c0_i32_0 = arith.constant 0 : i32
    %c0_i32_1 = arith.constant 0 : i32
    return %c0_i32, %c0_i32_0 : i32, i32
  }
  func.func @transform_6(%arg0: i32) -> (i32, i32) {
    %c0_i32 = arith.constant 0 : i32
    %c0_i32_0 = arith.constant 0 : i32
    %c0_i32_1 = arith.constant 0 : i32
    return %c0_i32, %c0_i32_0 : i32, i32
  }
  func.func @transform_7(%arg0: i32) -> (i32, i32) {
    %c0_i32 = arith.constant 0 : i32
    %c0_i32_0 = arith.constant 0 : i32
    %c0_i32_1 = arith.constant 0 : i32
    return %c0_i32, %c0_i32_0 : i32, i32
  }
  func.func @transform_8(%arg0: i32) -> (i32, i32) {
    %c0_i32 = arith.constant 0 : i32
    %c0_i32_0 = arith.constant 0 : i32
    %c0_i32_1 = arith.constant 0 : i32
    return %c0_i32, %c0_i32_0 : i32, i32
  }
  func.func @transform_9(%arg0: i32) -> (i32, i32) {
    %c0_i32 = arith.constant 0 : i32
    %c0_i32_0 = arith.constant 0 : i32
    return %arg0, %c0_i32 : i32, i32
  }
}

</mosaic_0001>

<bundles_post_ra>
// kernel: tpu_custom_call.1
= control target key start
LH: loop header
LB: loop body
LE: loop exit
PB: predicated region body
PF: predicated region fallthrough
CT: control target
= control target key end

     0   :  { %14 = vsyncpa [#allocation3], 0  ;;  %s1023_s0 = inlined_call_operand.hbm [shape: f32[8,16], index: 0, kind: input, shape index: {}]   ;;  %s1024_s1 = inlined_call_operand.vmem [shape: f32[16,128], index: 1, kind: input, shape index: {}]   ;;  %s1025_s2 = inlined_call_operand.vmem [shape: f32[1,128], index: 2, kind: input, shape index: {}]   ;;  %s1026_s3 = inlined_call_operand.vmem [shape: f32[128,128], index: 3, kind: input, shape index: {}]   ;;  %s1027_s4 = inlined_call_operand.vmem [shape: f32[1,128], index: 4, kind: input, shape index: {}]   ;;  %s1028_s5 = inlined_call_operand.hbm [shape: f32[128,128], index: 5, kind: input, shape index: {}]   ;;  %s1029_s6 = inlined_call_operand.vmem [shape: f32[1,128], index: 6, kind: input, shape index: {}]   ;;  %s1030_s7 = inlined_call_operand.vmem [shape: f32[128,8], index: 7, kind: input, shape index: {}]   ;;  %s1031_s8 = inlined_call_operand.vmem [shape: f32[1,8], index: 8, kind: input, shape index: {}]   ;;  %s1032_s9 = inlined_call_operand.hbm [shape: f32[8,8], index: 9, kind: output, shape index: {}]  }
   0x1   :  { %15 = vsyncpa [#allocation6], 0 }
   0x2   :  { %16 = vsyncpa [#allocation4], 0  ;;  %s775_s30 = smov [#allocation2]   ;;  %s776_s11 = smov [#allocation5]  }
   0x3   :  { %s23_s10 = sshll.u32 %s775_s30, 4  ;;  %s40_s12 = sshll.u32 %s776_s11, 4  ;;  %s24_s10 = int_to_ptr.vmem [resolvable:$true] %s23_s10  ;;  %s833_s12 = int_to_ptr.vmem [resolvable:$true] %s40_s12 }
   0x4   :  { %s703_s15 = scalar_lea.hbm %s1023_s0, 128 }
   0x5   :  { %p704_p0 = scmp.ne.s32.totalorder %s1023_s0, %s703_s15  ;;  %p707_p1 = scmp.lt.u32.totalorder %s703_s15, %s1023_s0 }
   0x7   :  { %p709_p2 = pnand %p707_p1, %p704_p0 }
   0x9   :  { %712 = shalt.err (!%p709_p2)
}
   0xa   :  { %s713_s20 = scalar_lea.vmem %s24_s10, 128  ;;  %p718_p4 = scmp.lt.s32.totalorder %s24_s10, %s24_s10 }
   0xb   :  { %p714_p3 = scmp.ne.s32.totalorder %s24_s10, %s713_s20  ;;  %p719_p5 = scmp.lt.s32.totalorder %s713_s20, %s713_s20 }
   0xd   :  { %p720_p6 = por %p719_p5, %p718_p4 }
   0xf   :  { %p721_p7 = pnand %p720_p6, %p714_p3 }
  0x11   :  { %724 = shalt.err (!%p721_p7)
}
  0x12   :  { %26 = dma.hbm_to_vmem [thread:$0]  %s1023_s0, 128, %s24_s10, [#allocation3]  }
  0x13   :  { %s725_s25 = scalar_lea.hbm %s1028_s5, 2048 }
  0x14   :  { %p726_p8 = scmp.ne.s32.totalorder %s1028_s5, %s725_s25  ;;  %p729_p9 = scmp.lt.u32.totalorder %s725_s25, %s1028_s5 }
  0x16   :  { %p731_p10 = pnand %p729_p9, %p726_p8 }
  0x18   :  { %734 = shalt.err (!%p731_p10)
}
  0x19   :  { %s735_s30 = scalar_lea.vmem %s833_s12, 2048  ;;  %p740_p12 = scmp.lt.s32.totalorder %s833_s12, %s833_s12 }
  0x1a   :  { %p736_p11 = scmp.ne.s32.totalorder %s833_s12, %s735_s30  ;;  %p741_p13 = scmp.lt.s32.totalorder %s735_s30, %s735_s30 }
  0x1c   :  { %p742_p0 = por %p741_p13, %p740_p12 }
  0x1e   :  { %p743_p1 = pnand %p742_p0, %p736_p11 }
  0x20   :  { %746 = shalt.err (!%p743_p1)
}
  0x21   :  { %s777_s0 = smov 128   ;;  %s778_s10 = smov 8  }
  0x22   :  { %46 = dma.hbm_to_vmem [thread:$0]  %s1028_s5, 2048, %s833_s12, [#allocation6], %s777_s0, %s777_s0, %s778_s10  }
  0x23   :  { %769 = dma.done.wait [#allocation3], 128  }
  0x24   :  { %770 = vsyncadd [#allocation3], 4294967168 }
  0x25   :  { %771 = dma.done.wait [#allocation6], 2048  }
  0x26   :  { %772 = vsyncadd [#allocation6], 4294965248  ;;  %v779_v0 = vmov 0.0|0.0   ;;  %vm780_vm0 = vmmov 0   ;;  %v781_v1 = vmov 0.0   ;;  %v60_v2 = vld [vmem:[%s1024_s1] sm:$0xff] }
  0x27   :  { %614 = vmatprep.subr.bf16.mxu0 %v779_v0  ;;  %506 = vmatprep.mubr.msk.f32.mxu0 %vm780_vm0, %v781_v1  ;;  %v61_v3 = vld [vmem:[%s1024_s1 + $0x8] sm:$0xff]  ;;  %v144_v5 = vld [vmem:[%s1026_s3] sm:$0xff]  ;;  %v146_v7 = vld [vmem:[%s1026_s3 + $0x10] sm:$0xff]  ;;  %vm69_vm1 = vcmask 130048   ;;  %vm425_vm2 = vcmask 64512  }
  0x28   :  { %617 = vmatprep.subr.bf16.mxu1 %v779_v0  ;;  %541 = vmatprep.mubr.msk.f32.mxu1 %vm780_vm0, %v781_v1  ;;  %v615_v4 = vpack.c.bf16 %v61_v3, %v60_v2  ;;  %v145_v6 = vld [vmem:[%s1026_s3 + $0x8] sm:$0xff]  ;;  %v147_v9 = vld [vmem:[%s1026_s3 + $0x18] sm:$0xff]  ;;  %v59_v10 = vld [vmem:[#allocation2] sm:$0xff] }
  0x29   :  { %v618_v8 = vpack.c.bf16 %v145_v6, %v144_v5  ;;  %v621_v11 = vpack.c.bf16 %v147_v9, %v146_v7  ;;  %v148_v12 = vld [vmem:[%s1026_s3 + $0x20] sm:$0xff]  ;;  %v149_v13 = vld [vmem:[%s1026_s3 + $0x28] sm:$0xff]  ;;  %v150_v15 = vld [vmem:[%s1026_s3 + $0x30] sm:$0xff] }
  0x2a   :  { %616 = vmatpush3.bf16.msra.mxu0 %v615_v4  ;;  %v624_v14 = vpack.c.bf16 %v149_v13, %v148_v12  ;;  %v151_v16 = vld [vmem:[%s1026_s3 + $0x38] sm:$0xff]  ;;  %v152_v18 = vld [vmem:[%s1026_s3 + $0x40] sm:$0xff]  ;;  %v153_v19 = vld [vmem:[%s1026_s3 + $0x48] sm:$0xff] }
  0x2b   :  { %619 = vmatpush3.bf16.msra.mxu1 %v618_v8  ;;  %641 = vmatprep.subr.bf16.mxu0 %v779_v0  ;;  %v627_v17 = vpack.c.bf16 %v151_v16, %v150_v15  ;;  %v630_v20 = vpack.c.bf16 %v153_v19, %v152_v18  ;;  %v154_v21 = vld [vmem:[%s1026_s3 + $0x50] sm:$0xff]  ;;  %v155_v22 = vld [vmem:[%s1026_s3 + $0x58] sm:$0xff]  ;;  %v156_v24 = vld [vmem:[%s1026_s3 + $0x60] sm:$0xff] }
  0x2c   :  { %620 = vmatprep.subr.bf16.mxu1 %v779_v0  ;;  %v633_v23 = vpack.c.bf16 %v155_v22, %v154_v21  ;;  %v157_v25 = vld [vmem:[%s1026_s3 + $0x68] sm:$0xff]  ;;  %v158_v27 = vld [vmem:[%s1026_s3 + $0x70] sm:$0xff]  ;;  %v159_v28 = vld [vmem:[%s1026_s3 + $0x78] sm:$0xff] }
  0x2d   :  { %507 = vmatmul.mubr.msk.f32.vlgmr.msra.gmra.mrb[0].mxu0 %vm69_vm1, %v59_v10  ;;  %v636_v26 = vpack.c.bf16 %v157_v25, %v156_v24  ;;  %v639_v29 = vpack.c.bf16 %v159_v28, %v158_v27  ;;  %v238_v30 = vld [vmem:[#allocation5] sm:$0xff]  ;;  %v239_v31 = vld [vmem:[#allocation5 + $0x8] sm:$0xff]  ;;  %v240_v32 = vld [vmem:[#allocation5 + $0x10] sm:$0xff] }
  0x2e   :  { %576 = vmatprep.mubr.msk.f32.mxu0 %vm780_vm0, %v781_v1  ;;  %v642_v33 = vpack.c.bf16 %v239_v31, %v238_v30  ;;  %v241_v34 = vld [vmem:[#allocation5 + $0x18] sm:$0xff]  ;;  %v242_v36 = vld [vmem:[#allocation5 + $0x20] sm:$0xff]  ;;  %v243_v37 = vld [vmem:[#allocation5 + $0x28] sm:$0xff] }
  0x2f   :  { %622 = vmatpush3.bf16.msra.mxu1 %v621_v11  ;;  %v645_v35 = vpack.c.bf16 %v241_v34, %v240_v32  ;;  %v648_v38 = vpack.c.bf16 %v243_v37, %v242_v36  ;;  %v244_v39 = vld [vmem:[#allocation5 + $0x30] sm:$0xff]  ;;  %v245_v40 = vld [vmem:[#allocation5 + $0x38] sm:$0xff]  ;;  %v246_v42 = vld [vmem:[#allocation5 + $0x40] sm:$0xff] }
  0x30   :  { %623 = vmatprep.subr.bf16.mxu1 %v779_v0  ;;  %643 = vmatpush3.bf16.msra.mxu0 %v642_v33  ;;  %v651_v41 = vpack.c.bf16 %v245_v40, %v244_v39  ;;  %v247_v43 = vld [vmem:[#allocation5 + $0x48] sm:$0xff]  ;;  %v443_v45 = vld [vmem:[%s1025_s2] ss:$0 sm:$0xff]  ;;  %v248_v50 = vld [vmem:[#allocation5 + $0x50] sm:$0xff] }
  0x31   :  { %644 = vmatprep.subr.bf16.mxu0 %v779_v0  ;;  %v654_v44 = vpack.c.bf16 %v247_v43, %v246_v42  ;;  %v249_v51 = vld [vmem:[#allocation5 + $0x58] sm:$0xff]  ;;  %v250_v53 = vld [vmem:[#allocation5 + $0x60] sm:$0xff]  ;;  %v251_v54 = vld [vmem:[#allocation5 + $0x68] sm:$0xff] }
  0x32   :  { %v657_v52 = vpack.c.bf16 %v249_v51, %v248_v50  ;;  %v660_v55 = vpack.c.bf16 %v251_v54, %v250_v53  ;;  %v252_v56 = vld [vmem:[#allocation5 + $0x70] sm:$0xff]  ;;  %v253_v57 = vld [vmem:[#allocation5 + $0x78] sm:$0xff]  ;;  %v333_v60 = vld [vmem:[%s1030_s7 + $0x8] sm:$0xff] }
  0x33   :  { %625 = vmatpush3.bf16.msra.mxu1 %v624_v14  ;;  %v663_v58 = vpack.c.bf16 %v253_v57, %v252_v56  ;;  %v332_v59 = vld [vmem:[%s1030_s7] sm:$0xff]  ;;  %v334_v61 = vld [vmem:[%s1030_s7 + $0x10] sm:$0xff]  ;;  %v335_v63 = vld [vmem:[%s1030_s7 + $0x18] sm:$0xff] }
  0x34   :  { %626 = vmatprep.subr.bf16.mxu1 %v779_v0  ;;  %646 = vmatpush3.bf16.msra.mxu0 %v645_v35  ;;  %v666_v62 = vpack.c.bf16 %v333_v60, %v332_v59  ;;  %v336_v2 = vld [vmem:[%s1030_s7 + $0x20] sm:$0xff]  ;;  %v337_v3 = vld [vmem:[%s1030_s7 + $0x28] sm:$0xff]  ;;  %v338_v5 = vld [vmem:[%s1030_s7 + $0x30] sm:$0xff] }
  0x35   :  { %647 = vmatprep.subr.bf16.mxu0 %v779_v0  ;;  %v672_v4 = vpack.c.bf16 %v337_v3, %v336_v2  ;;  %v339_v6 = vld [vmem:[%s1030_s7 + $0x38] sm:$0xff]  ;;  %v340_v8 = vld [vmem:[%s1030_s7 + $0x40] sm:$0xff]  ;;  %v341_v9 = vld [vmem:[%s1030_s7 + $0x48] sm:$0xff] }
  0x36   :  { %v675_v7 = vpack.c.bf16 %v339_v6, %v338_v5  ;;  %v678_v10 = vpack.c.bf16 %v341_v9, %v340_v8  ;;  %v445_v11 = vld [vmem:[%s1027_s4] ss:$0 sm:$0xff]  ;;  %v342_v16 = vld [vmem:[%s1030_s7 + $0x50] sm:$0xff] }
  0x37   :  { %628 = vmatpush3.bf16.msra.mxu1 %v627_v17  ;;  %v343_v17 = vld [vmem:[%s1030_s7 + $0x58] sm:$0xff]  ;;  %v344_v19 = vld [vmem:[%s1030_s7 + $0x60] sm:$0xff]  ;;  %v346_v22 = vld [vmem:[%s1030_s7 + $0x70] sm:$0xff] }
  0x38   :  { %629 = vmatprep.subr.bf16.mxu1 %v779_v0  ;;  %649 = vmatpush3.bf16.msra.mxu0 %v648_v38  ;;  %v681_v18 = vpack.c.bf16 %v343_v17, %v342_v16  ;;  %v446_v25 = vld [vmem:[%s1029_s6] ss:$0 sm:$0xff] }
  0x39   :  { %650 = vmatprep.subr.bf16.mxu0 %v779_v0  ;;  %v447_v30 = vld [vmem:[%s1031_s8] ss:$0 sm:$0xff] }
  0x3b   :  { %631 = vmatpush3.bf16.msra.mxu1 %v630_v20  ;;  %v345_v20 = vld [vmem:[%s1030_s7 + $0x68] sm:$0xff] }
  0x3c   :  { %632 = vmatprep.subr.bf16.mxu1 %v779_v0  ;;  %652 = vmatpush3.bf16.msra.mxu0 %v651_v41  ;;  %v684_v21 = vpack.c.bf16 %v345_v20, %v344_v19 }
  0x3d   :  { %653 = vmatprep.subr.bf16.mxu0 %v779_v0 }
  0x3f   :  { %634 = vmatpush3.bf16.msra.mxu1 %v633_v23  ;;  %v347_v23 = vld [vmem:[%s1030_s7 + $0x78] sm:$0xff]  ;;  %s782_s7 = smov [#allocation7]  }
  0x40   :  { %635 = vmatprep.subr.bf16.mxu1 %v779_v0  ;;  %655 = vmatpush3.bf16.msra.mxu0 %v654_v44  ;;  %v687_v24 = vpack.c.bf16 %v347_v23, %v346_v22  ;;  %s433_s13 = sshll.u32 %s782_s7, 4  ;;  %s434_s13 = int_to_ptr.vmem [resolvable:$true] %s433_s13 }
  0x41   :  { %656 = vmatprep.subr.bf16.mxu0 %v779_v0  ;;  %s747_s14 = scalar_lea.vmem %s434_s13, 128  ;;  %p752_p3 = scmp.lt.s32.totalorder %s434_s13, %s434_s13 }
  0x42   :  { %p748_p2 = scmp.ne.s32.totalorder %s434_s13, %s747_s14  ;;  %p753_p4 = scmp.lt.s32.totalorder %s747_s14, %s747_s14 }
  0x43   :  { %637 = vmatpush3.bf16.msra.mxu1 %v636_v26 }
  0x44   :  { %638 = vmatprep.subr.bf16.mxu1 %v779_v0  ;;  %658 = vmatpush3.bf16.msra.mxu0 %v657_v52  ;;  %p754_p5 = por %p753_p4, %p752_p3 }
  0x45   :  { %659 = vmatprep.subr.bf16.mxu0 %v779_v0 }
  0x46   :  { %p755_p6 = pnand %p754_p5, %p748_p2 }
  0x47   :  { %640 = vmatpush3.bf16.msra.mxu1 %v639_v29 }
  0x48   :  { %665 = vmatprep.subr.bf16.mxu1 %v779_v0  ;;  %661 = vmatpush3.bf16.msra.mxu0 %v660_v55 }
  0x49   :  { %662 = vmatprep.subr.bf16.mxu0 %v779_v0 }
  0x4c   :  { %664 = vmatpush3.bf16.msra.mxu0 %v663_v58 }
 0x100   :  { %v139_v46 = vpop.f32.mrb[0].mxu0 }
 0x101   :  { %v140_v47 = vadd.f32 %v443_v45, %v139_v46  ;;  %v508_v48 = vpop.f32.mrb[1].mxu0 }
 0x103   :  { %697 = vtanh.f32 %v140_v47 }
 0x10d   :  { %v698_v49 = vpop.eup %697 }
 0x10e   :  { %542 = vmatmul.mubr.f32.vlgmr.msra.gmra.mrb[0].mxu1 %v698_v49 }
 0x10f   :  { %611 = vmatprep.mubr.msk.f32.mxu1 %vm780_vm0, %v781_v1  ;;  %667 = vmatpush3.bf16.msra.mxu1 %v666_v62  ;;  %v669_v1 = vpack.c.bf16 %v335_v63, %v334_v61 }
 0x110   :  { %668 = vmatprep.subr.bf16.mxu1 %v779_v0 }
 0x113   :  { %670 = vmatpush3.bf16.msra.mxu1 %v669_v1 }
 0x114   :  { %671 = vmatprep.subr.bf16.mxu1 %v779_v0 }
 0x117   :  { %673 = vmatpush3.bf16.msra.mxu1 %v672_v4 }
 0x118   :  { %674 = vmatprep.subr.bf16.mxu1 %v779_v0 }
 0x11b   :  { %676 = vmatpush3.bf16.msra.mxu1 %v675_v7 }
 0x11c   :  { %677 = vmatprep.subr.bf16.mxu1 %v779_v0 }
 0x11f   :  { %679 = vmatpush3.bf16.msra.mxu1 %v678_v10 }
 0x120   :  { %680 = vmatprep.subr.bf16.mxu1 %v779_v0 }
 0x123   :  { %682 = vmatpush3.bf16.msra.mxu1 %v681_v18 }
 0x124   :  { %683 = vmatprep.subr.bf16.mxu1 %v779_v0 }
 0x127   :  { %685 = vmatpush3.bf16.msra.mxu1 %v684_v21 }
 0x128   :  { %686 = vmatprep.subr.bf16.mxu1 %v779_v0 }
 0x12b   :  { %688 = vmatpush3.bf16.msra.mxu1 %v687_v24 }
 0x1e1   :  { %v233_v12 = vpop.f32.mrb[0].mxu1 }
 0x1e2   :  { %v234_v13 = vadd.f32 %v445_v11, %v233_v12  ;;  %v543_v14 = vpop.f32.mrb[1].mxu1 }
 0x1e4   :  { %699 = vtanh.f32 %v234_v13 }
 0x1ee   :  { %v700_v15 = vpop.eup %699 }
 0x1ef   :  { %577 = vmatmul.mubr.f32.vlgmr.msra.gmra.mrb[2].mxu0 %v700_v15 }
 0x2c2   :  { %v327_v26 = vpop.f32.mrb[2].mxu0 }
 0x2c3   :  { %v328_v27 = vadd.f32 %v446_v25, %v327_v26  ;;  %v578_v28 = vpop.f32.mrb[3].mxu0 }
 0x2c5   :  { %701 = vtanh.f32 %v328_v27 }
 0x2cf   :  { %v702_v29 = vpop.eup %701 }
 0x2d0   :  { %612 = vmatmul.mubr.f32.vlgmr.msra.gmra.mrb[2].mxu1 %v702_v29 }
 0x3a3   :  { %v421_v31 = vpop.f32.mrb[2].mxu1 }
 0x3a4   :  { %v422_v0 = vadd.f32 %v447_v30, %v421_v31  ;;  %v613_v32 = vpop.f32.mrb[3].mxu1 }
 0x3a6   :  { %426 = vst.msk [vmem:[#allocation7] sm:$0xff] %vm425_vm2, %v422_v0 }
 0x3a7   :  { %758 = shalt.err (!%p755_p6)
}
 0x3a8   :  { %s759_s5 = scalar_lea.hbm %s1032_s9, 128 }
 0x3a9   :  { %p760_p7 = scmp.ne.s32.totalorder %s1032_s9, %s759_s5  ;;  %p763_p8 = scmp.lt.u32.totalorder %s759_s5, %s1032_s9 }
 0x3ab   :  { %p765_p9 = pnand %p763_p8, %p760_p7 }
 0x3ad   :  { %768 = shalt.err (!%p765_p9)
}
 0x3ae   :  { %436 = dma.vmem_to_hbm [thread:$0]  %s434_s13, 128, %s1032_s9, [#allocation4]  }
 0x3af   :  { %773 = dma.done.wait [#allocation4], 128  }
 0x3b0   :  { %774 = vsyncadd [#allocation4], 4294967168 }
 0x3b1   :  { %440 = vsyncpa [#allocation3], 1 }
 0x3b2   :  { %441 = vsyncpa [#allocation6], 1 }
 0x3b3   :  { %442 = vsyncpa [#allocation4], 1 }

</bundles_post_ra>
